<compile_context>
chip_gen: v6e
topology: v6e:2x2x1
jax: 0.10.0
libtpu: 0.0.40
codegen_flags: <defaults>
</compile_context>

<pallas_src>
import functools

import jax
import jax.numpy as jnp
from jax.experimental import pallas as pl
from jax.experimental.pallas import tpu as pltpu

_MIN_LANES = 128
_LANE_CANDIDATES = (1024, 512, 256, 128)   # lane-dense slab widths (multiples of 128)
_MIN_SPLIT_BYTES = 1 * 1024 * 1024         # below this stay at one block (latency-bound)


def _hswish_math(x):
    # relu6(y) = clip(y, 0, 6); 0.16666666667 is the module's literal (== f32(1/6)).
    return x * jnp.clip(x + 3.0, 0.0, 6.0) * 0.16666666667


def _hswish_kernel(x_ref, o_ref):
    o_ref[...] = _hswish_math(x_ref[...]).astype(o_ref.dtype)


def _chip_params():
    """(target bytes per block buffer, vmem limit bytes), tuned per TPU generation."""
    try:
        kind = jax.devices()[0].device_kind.lower()
    except Exception:
        kind = ""
    if "v7" in kind or "7x" in kind:
        # ~3.2 TB/s per-TC HBM: 6 MiB blocks keep the ~0.35us/step overhead to a few %.
        # 4 live buffers x 6 MiB = 24 MiB; 48 MiB limit leaves headroom under 64 MiB VMEM.
        return 6 * 1024 * 1024, 48 * 1024 * 1024
    if "v6" in kind:
        return 4 * 1024 * 1024, 32 * 1024 * 1024
    # v5e (0.82 TB/s) and unknown chips: 2 MiB blocks are already ~93-95% of roofline.
    return 2 * 1024 * 1024, 32 * 1024 * 1024


def _hswish_2d(x2d, *, donate_input):
    """Run the elementwise kernel over a lane-dense (rows, lanes) slab."""
    rows, lanes = x2d.shape
    itemsize = jnp.dtype(x2d.dtype).itemsize
    target_block_bytes, vmem_limit = _chip_params()

    # dtype-aware sublane multiple: 8 (f32), 16 (bf16/f16), 32 (int8/fp8).
    sublane_mult = 8 * max(1, 4 // itemsize)

    row_tile = target_block_bytes // (lanes * itemsize)
    row_tile = max(sublane_mult, (row_tile // sublane_mult) * sublane_mult)
    if row_tile >= rows:
        if rows >= 2 * sublane_mult and rows * lanes * itemsize >= _MIN_SPLIT_BYTES:
            # Force >=2 grid steps: pipelines in-DMA/compute/out-DMA and lets
            # both of v7x's TensorCores stream via "parallel" semantics.
            half = pl.cdiv(rows, 2)
            row_tile = max(sublane_mult, (half // sublane_mult) * sublane_mult)
        else:
            row_tile = rows  # tiny input: single full-extent block
    grid = (pl.cdiv(rows, row_tile),)  # ragged final block: OOB stores are masked

    n = rows * lanes
    cost = pl.CostEstimate(
        flops=5 * n,
        transcendentals=0,
        bytes_accessed=2 * n * itemsize,
    )

    return pl.pallas_call(
        _hswish_kernel,
        out_shape=jax.ShapeDtypeStruct((rows, lanes), x2d.dtype),
        grid_spec=pltpu.PrefetchScalarGridSpec(
            num_scalar_prefetch=0,
            grid=grid,
            in_specs=[pl.BlockSpec((row_tile, lanes), lambda i: (i, 0))],
            out_specs=pl.BlockSpec((row_tile, lanes), lambda i: (i, 0)),
        ),
        compiler_params=pltpu.CompilerParams(
            dimension_semantics=("parallel",),
            vmem_limit_bytes=vmem_limit,
        ),
        cost_estimate=cost,
        input_output_aliases={0: 0} if donate_input else {},
    )(x2d)


@functools.partial(jax.jit, static_argnames=("donate_input",))
def hswish(x: jax.Array, *, donate_input: bool = False) -> jax.Array:
    """Elementwise hard-swish, matching Hswish.forward exactly.

    jit'ed so the flatten/reshape plumbing around the pallas_call lowers to
    free bitcasts (contiguous inputs) instead of extra HBM round-trips.
    Pass donate_input=True (and donate the arg at the call site) to write the
    result in place of the input buffer (torch's inplace=True analogue).
    """
    orig_shape = x.shape
    n = x.size
    if n == 0:
        return x

    flat = x.reshape(-1)
    rem = n % _MIN_LANES
    n_aligned = n - rem

    if n_aligned == 0:
        # Fewer than 128 elements: a single fused VPU op beats any kernel launch.
        return _hswish_math(x)

    # Lane-dense slab: widest candidate lane width that divides the aligned prefix.
    lanes = _MIN_LANES
    for w in _LANE_CANDIDATES:
        if n_aligned % w == 0:
            lanes = w
            break
    rows = n_aligned // lanes

    head = flat if rem == 0 else flat[:n_aligned]
    out_head = _hswish_2d(head.reshape(rows, lanes), donate_input=donate_input)
    out_flat = out_head.reshape(-1)

    if rem:
        # <=127 trailing elements: compute with plain jnp and append.
        # TODO(synk): handle the ragged tail inside the kernel (BoundedSlice /
        # manual DMA) to also avoid the concatenate copy of the output.
        out_flat = jnp.concatenate([out_flat, _hswish_math(flat[n_aligned:])])

    return out_flat.reshape(orig_shape)


if __name__ == "__main__":
    key = jax.random.PRNGKey(0)
    # NCHW, consistent with torch conv-style activation inputs.
    x = jax.random.normal(key, (2, 4, 16, 16), dtype=jnp.float32) * 4.0

    y = hswish(x)
    jax.block_until_ready(y)

    y_ref = _hswish_math(x)
    assert y.shape == x.shape and y.dtype == x.dtype
    assert jnp.allclose(y, y_ref, atol=1e-6, rtol=1e-6)

    print("KERNEL_OK")
</pallas_src>

<mosaic_0001>
module attributes {stable_mosaic.version = 11 : i64} {
  func.func @_hswish_kernel(%arg0: i32, %arg1: memref<2x1024xf32, #tpu.memory_space<vmem>>, %arg2: memref<2x1024xf32, #tpu.memory_space<vmem>>) attributes {dimension_semantics = [#tpu.dimension_semantics<parallel>], iteration_bounds = array<i64: 1>, scalar_prefetch = 0 : i64, scratch_operands = 0 : i64, tpu.core_type = #tpu.core_type<tc>, window_params = [{transform_indices = @transform_0, window_bounds = array<i64: 2, 1024>}, {transform_indices = @transform_1, window_bounds = array<i64: 2, 1024>}]} {
    %c0 = arith.constant 0 : index
    %c0_0 = arith.constant 0 : index
    %0 = vector.load %arg1[%c0, %c0_0] : memref<2x1024xf32, #tpu.memory_space<vmem>>, vector<2x1024xf32>
    %cst = arith.constant 3.000000e+00 : f32
    %1 = vector.broadcast %cst : f32 to vector<2x1024xf32>
    %2 = arith.addf %0, %1 : vector<2x1024xf32>
    %cst_1 = arith.constant 0.000000e+00 : f32
    %cst_2 = arith.constant 6.000000e+00 : f32
    %3 = vector.broadcast %cst_1 : f32 to vector<2x1024xf32>
    %4 = arith.maximumf %3, %2 : vector<2x1024xf32>
    %5 = vector.broadcast %cst_2 : f32 to vector<2x1024xf32>
    %6 = arith.minimumf %5, %4 : vector<2x1024xf32>
    %7 = arith.mulf %0, %6 : vector<2x1024xf32>
    %cst_3 = arith.constant 0.166666672 : f32
    %8 = vector.broadcast %cst_3 : f32 to vector<2x1024xf32>
    %9 = arith.mulf %7, %8 : vector<2x1024xf32>
    %c0_4 = arith.constant 0 : index
    %c0_5 = arith.constant 0 : index
    %10 = vector.load %arg2[%c0_4, %c0_5] : memref<2x1024xf32, #tpu.memory_space<vmem>>, vector<2x1024xf32>
    tpu.vector_store %arg2[%c0_4, %c0_5], %9 {strides = array<i32>} : memref<2x1024xf32, #tpu.memory_space<vmem>>, vector<2x1024xf32>,
    return
  }
  func.func @transform_0(%arg0: i32) -> (i32, i32) {
    %c0_i32 = arith.constant 0 : i32
    %c0_i32_0 = arith.constant 0 : i32
    return %arg0, %c0_i32 : i32, i32
  }
  func.func @transform_1(%arg0: i32) -> (i32, i32) {
    %c0_i32 = arith.constant 0 : i32
    %c0_i32_0 = arith.constant 0 : i32
    return %arg0, %c0_i32 : i32, i32
  }
}

</mosaic_0001>

<bundles_post_ra>
// kernel: hswish.1
= control target key start
LH: loop header
LB: loop body
LE: loop exit
PB: predicated region body
PF: predicated region fallthrough
CT: control target
= control target key end

     0   :  { %s48_s0 = inlined_call_operand.vmem [shape: f32[2,1024], index: 0, kind: input, shape index: {}]   ;;  %s49_s1 = inlined_call_operand.vmem [shape: f32[2,1024], index: 1, kind: output, shape index: {}]  }
   0x1   :  { %v8_v0 = vld [vmem:[%s48_s0] sm:$0xff]  ;;  %v9_v1 = vld [vmem:[%s48_s0 + $0x8] sm:$0xff] }
   0x2   :  { %v10_v2 = vadd.f32 3.0, %v8_v0  ;;  %v11_v3 = vadd.f32 3.0, %v9_v1 }
   0x4   :  { %v12_v4 = vmax.f32 %v10_v2, 0.0  ;;  %v13_v5 = vmax.f32 %v11_v3, 0.0 }
   0x6   :  { %v14_v6 = vmin.f32 %v12_v4, 6.0  ;;  %v15_v7 = vmin.f32 %v13_v5, 6.0 }
   0x8   :  { %v16_v8 = vmul.f32 %v14_v6, %v8_v0  ;;  %v17_v9 = vmul.f32 %v15_v7, %v9_v1 }
   0xa   :  { %v18_v10 = vmul.f32 0.16666667, %v16_v8  ;;  %v19_v11 = vmul.f32 0.16666667, %v17_v9 }
   0xc   :  { %20 = vst [vmem:[%s49_s1] sm:$0xff] %v18_v10  ;;  %21 = vst [vmem:[%s49_s1 + $0x8] sm:$0xff] %v19_v11 }

</bundles_post_ra>
